<compile_context>
chip_gen: v7x
topology: tpu7x:2x2x1
jax: 0.10.0
libtpu: 0.0.40
codegen_flags: <defaults>
</compile_context>

<pallas_src>
import jax
import jax.numpy as jnp
from jax.experimental import pallas as pl
from jax.experimental.pallas import tpu as pltpu


def _fused_conv1x1_kernel(x1_ref, x2_ref, w1_ref, w2_ref, b_ref, o_ref):
    # x1_ref: (C1, W), x2_ref: (C2, W)  -- channels on sublanes, time on lanes
    # w1_ref: (Cout, C1), w2_ref: (Cout, C2), b_ref: (Cout, 1)
    # o_ref : (Cout, W)
    acc = jnp.dot(w1_ref[...], x1_ref[...], preferred_element_type=jnp.float32)
    acc = acc + jnp.dot(w2_ref[...], x2_ref[...],
                        preferred_element_type=jnp.float32)
    acc = acc + b_ref[...]            # (Cout, 1) broadcasts across the lanes
    o_ref[...] = acc.astype(o_ref.dtype)


def _cost_estimate(B, L, C1, C2, Cout):
    flops = 2 * B * L * (C1 + C2) * Cout
    bytes_accessed = 4 * B * L * (C1 + C2 + Cout) + 4 * Cout * (C1 + C2 + 1)
    return pl.CostEstimate(flops=flops,
                           bytes_accessed=bytes_accessed,
                           transcendentals=0)


def fused_conv1x1(x1_ncl, x2_ncl, w1, b1, w2, b2):
    """x1_ncl: (B, 32, L), x2_ncl: (B, 320, L) -> (B, 64, L), all NCL."""
    B, C1, L = x1_ncl.shape
    _, C2, _ = x2_ncl.shape
    Cout = w1.shape[0]

    # Conv weights (Cout, Cin, 1) -> (Cout, Cin); combined bias column.
    w1_mat = w1[:, :, 0]
    w2_mat = w2[:, :, 0]
    b_col = (b1 + b2).reshape(Cout, 1)
    cost = _cost_estimate(B, L, C1, C2, Cout)

    if L < 128:
        # Small-L fast path: fold (B, L) onto the lane axis and run a single
        # grid step.  Avoids B lane-sparse (masked-store) grid steps; the tiny
        # wrapper transpose is negligible at these sizes.
        W = B * L
        x1_2d = jnp.transpose(x1_ncl, (1, 0, 2)).reshape(C1, W)
        x2_2d = jnp.transpose(x2_ncl, (1, 0, 2)).reshape(C2, W)
        out2d = pl.pallas_call(
            _fused_conv1x1_kernel,
            out_shape=jax.ShapeDtypeStruct((Cout, W), x1_ncl.dtype),
            grid_spec=pl.GridSpec(
                grid=(1,),
                in_specs=[
                    pl.BlockSpec((C1, W), lambda i: (0, 0)),
                    pl.BlockSpec((C2, W), lambda i: (0, 0)),
                    pl.BlockSpec((Cout, C1), lambda i: (0, 0)),
                    pl.BlockSpec((Cout, C2), lambda i: (0, 0)),
                    pl.BlockSpec((Cout, 1), lambda i: (0, 0)),
                ],
                out_specs=pl.BlockSpec((Cout, W), lambda i: (0, 0)),
            ),
            compiler_params=pltpu.CompilerParams(
                dimension_semantics=("arbitrary",)),
            cost_estimate=cost,
        )(x1_2d, x2_2d, w1_mat, w2_mat, b_col)
        return jnp.transpose(out2d.reshape(Cout, B, L), (1, 0, 2))

    # Large-L path: tile L in lane-dense multiples of 128, up to 2048.
    # VMEM at TL=2048 (double-buffered x1 + x2 + out + weights) ~= 7 MiB,
    # safely inside v5e's 16 MiB scoped default (and v6e/v7x's 32 MiB).
    TL = min(L, 2048)
    TL -= TL % 128
    # Keep at least 2 grid steps total so both v7x TensorCores get work.
    while B * ((L + TL - 1) // TL) < 2 and TL > 128:
        TL = TL // 2
        TL -= TL % 128

    out = pl.pallas_call(
        _fused_conv1x1_kernel,
        out_shape=jax.ShapeDtypeStruct((B, Cout, L), x1_ncl.dtype),
        grid_spec=pl.GridSpec(
            grid=(B, pl.cdiv(L, TL)),
            in_specs=[
                # Batch dim squeezed (None) so the kernel sees 2-D tiles.
                pl.BlockSpec((None, C1, TL), lambda b, l: (b, 0, l)),
                pl.BlockSpec((None, C2, TL), lambda b, l: (b, 0, l)),
                pl.BlockSpec((Cout, C1), lambda b, l: (0, 0)),
                pl.BlockSpec((Cout, C2), lambda b, l: (0, 0)),
                pl.BlockSpec((Cout, 1), lambda b, l: (0, 0)),
            ],
            out_specs=pl.BlockSpec((None, Cout, TL), lambda b, l: (b, 0, l)),
        ),
        compiler_params=pltpu.CompilerParams(
            dimension_semantics=("parallel", "parallel")),
        cost_estimate=cost,
    )(x1_ncl, x2_ncl, w1_mat, w2_mat, b_col)
    return out


def reference(x1, x2, w1, b1, w2, b2):
    # Pure-JAX reference of the PyTorch forward (Conv1d k=1 == einsum).
    y1 = jnp.einsum("bcl,oc->bol", x1, w1[:, :, 0],
                    precision=jax.lax.Precision.HIGHEST) + b1[None, :, None]
    y2 = jnp.einsum("bcl,oc->bol", x2, w2[:, :, 0],
                    precision=jax.lax.Precision.HIGHEST) + b2[None, :, None]
    return y1 + y2


if __name__ == "__main__":
    key = jax.random.PRNGKey(0)
    k1, k2, k3, k4, k5, k6, k7, k8 = jax.random.split(key, 8)

    C1, C2, Cout = 32, 320, 64

    # Deterministic parameter init (PyTorch Conv1d-like uniform fan-in scaling).
    bound1 = 1.0 / (C1 ** 0.5)
    bound2 = 1.0 / (C2 ** 0.5)
    w1 = jax.random.uniform(k1, (Cout, C1, 1), jnp.float32, -bound1, bound1)
    b1 = jax.random.uniform(k2, (Cout,), jnp.float32, -bound1, bound1)
    w2 = jax.random.uniform(k3, (Cout, C2, 1), jnp.float32, -bound2, bound2)
    b2 = jax.random.uniform(k4, (Cout,), jnp.float32, -bound2, bound2)

    run = jax.jit(fused_conv1x1)

    # Small shape (PyTorch NCL layout): exercises the folded small-L path.
    B, L = 2, 16
    x1 = jax.random.normal(k5, (B, C1, L), jnp.float32)
    x2 = jax.random.normal(k6, (B, C2, L), jnp.float32)
    out = jax.block_until_ready(run(x1, x2, w1, b1, w2, b2))
    ref = reference(x1, x2, w1, b1, w2, b2)
    assert out.shape == (B, Cout, L), out.shape
    assert jnp.allclose(out, ref, atol=1e-3, rtol=1e-3), \
        float(jnp.max(jnp.abs(out - ref)))

    # Lane-dense shape: exercises the tiled NCL grid path.
    B2, L2 = 2, 512
    x1b = jax.random.normal(k7, (B2, C1, L2), jnp.float32)
    x2b = jax.random.normal(k8, (B2, C2, L2), jnp.float32)
    outb = jax.block_until_ready(run(x1b, x2b, w1, b1, w2, b2))
    refb = reference(x1b, x2b, w1, b1, w2, b2)
    assert outb.shape == (B2, Cout, L2), outb.shape
    assert jnp.allclose(outb, refb, atol=1e-3, rtol=1e-3), \
        float(jnp.max(jnp.abs(outb - refb)))

    print("KERNEL_OK")
</pallas_src>

<mosaic_0001>
module attributes {stable_mosaic.version = 11 : i64} {
  func.func @_fused_conv1x1_kernel(%arg0: i32, %arg1: memref<32x32xf32, #tpu.memory_space<vmem>>, %arg2: memref<320x32xf32, #tpu.memory_space<vmem>>, %arg3: memref<64x32xf32, #tpu.memory_space<vmem>>, %arg4: memref<64x320xf32, #tpu.memory_space<vmem>>, %arg5: memref<64x1xf32, #tpu.memory_space<vmem>>, %arg6: memref<64x32xf32, #tpu.memory_space<vmem>>) attributes {dimension_semantics = [#tpu.dimension_semantics<arbitrary>], iteration_bounds = array<i64: 1>, scalar_prefetch = 0 : i64, scratch_operands = 0 : i64, tpu.core_type = #tpu.core_type<tc>, window_params = [{pipeline_mode = #tpu.pipeline_mode<synchronous>, transform_indices = @transform_0, window_bounds = array<i64: 32, 32>}, {pipeline_mode = #tpu.pipeline_mode<synchronous>, transform_indices = @transform_1, window_bounds = array<i64: 320, 32>}, {pipeline_mode = #tpu.pipeline_mode<synchronous>, transform_indices = @transform_2, window_bounds = array<i64: 64, 32>}, {pipeline_mode = #tpu.pipeline_mode<synchronous>, transform_indices = @transform_3, window_bounds = array<i64: 64, 320>}, {pipeline_mode = #tpu.pipeline_mode<synchronous>, transform_indices = @transform_4, window_bounds = array<i64: 64, 1>}, {pipeline_mode = #tpu.pipeline_mode<synchronous>, transform_indices = @transform_5, window_bounds = array<i64: 64, 32>}]} {
    %c0 = arith.constant 0 : index
    %c0_0 = arith.constant 0 : index
    %0 = vector.load %arg3[%c0, %c0_0] : memref<64x32xf32, #tpu.memory_space<vmem>>, vector<64x32xf32>
    %c0_1 = arith.constant 0 : index
    %c0_2 = arith.constant 0 : index
    %1 = vector.load %arg1[%c0_1, %c0_2] : memref<32x32xf32, #tpu.memory_space<vmem>>, vector<32x32xf32>
    %cst = arith.constant dense<0.000000e+00> : vector<64x32xf32>
    %2 = tpu.matmul %0, %1, %cst {dimension_numbers = #tpu.dot_dimension_numbers<[1], [0], [0], [1], [0, 0, 1, 1], [], []>} : vector<64x32xf32>, vector<32x32xf32>, vector<64x32xf32> -> vector<64x32xf32>
    %c0_3 = arith.constant 0 : index
    %c0_4 = arith.constant 0 : index
    %3 = vector.load %arg4[%c0_3, %c0_4] : memref<64x320xf32, #tpu.memory_space<vmem>>, vector<64x320xf32>
    %c0_5 = arith.constant 0 : index
    %c0_6 = arith.constant 0 : index
    %4 = vector.load %arg2[%c0_5, %c0_6] : memref<320x32xf32, #tpu.memory_space<vmem>>, vector<320x32xf32>
    %cst_7 = arith.constant dense<0.000000e+00> : vector<64x32xf32>
    %5 = tpu.matmul %3, %4, %cst_7 {dimension_numbers = #tpu.dot_dimension_numbers<[1], [0], [0], [1], [0, 0, 1, 1], [], []>} : vector<64x320xf32>, vector<320x32xf32>, vector<64x32xf32> -> vector<64x32xf32>
    %6 = arith.addf %2, %5 : vector<64x32xf32>
    %c0_8 = arith.constant 0 : index
    %c0_9 = arith.constant 0 : index
    %7 = vector.load %arg5[%c0_8, %c0_9] : memref<64x1xf32, #tpu.memory_space<vmem>>, vector<64x1xf32>
    %8 = vector.broadcast %7 : vector<64x1xf32> to vector<64x32xf32>
    %9 = arith.addf %6, %8 : vector<64x32xf32>
    %c0_10 = arith.constant 0 : index
    %c0_11 = arith.constant 0 : index
    %10 = vector.load %arg6[%c0_10, %c0_11] : memref<64x32xf32, #tpu.memory_space<vmem>>, vector<64x32xf32>
    tpu.vector_store %arg6[%c0_10, %c0_11], %9 {strides = array<i32>} : memref<64x32xf32, #tpu.memory_space<vmem>>, vector<64x32xf32>,
    return
  }
  func.func @transform_0(%arg0: i32) -> (i32, i32) {
    %c0_i32 = arith.constant 0 : i32
    %c0_i32_0 = arith.constant 0 : i32
    %c0_i32_1 = arith.constant 0 : i32
    return %c0_i32, %c0_i32_0 : i32, i32
  }
  func.func @transform_1(%arg0: i32) -> (i32, i32) {
    %c0_i32 = arith.constant 0 : i32
    %c0_i32_0 = arith.constant 0 : i32
    %c0_i32_1 = arith.constant 0 : i32
    return %c0_i32, %c0_i32_0 : i32, i32
  }
  func.func @transform_2(%arg0: i32) -> (i32, i32) {
    %c0_i32 = arith.constant 0 : i32
    %c0_i32_0 = arith.constant 0 : i32
    %c0_i32_1 = arith.constant 0 : i32
    return %c0_i32, %c0_i32_0 : i32, i32
  }
  func.func @transform_3(%arg0: i32) -> (i32, i32) {
    %c0_i32 = arith.constant 0 : i32
    %c0_i32_0 = arith.constant 0 : i32
    %c0_i32_1 = arith.constant 0 : i32
    return %c0_i32, %c0_i32_0 : i32, i32
  }
  func.func @transform_4(%arg0: i32) -> (i32, i32) {
    %c0_i32 = arith.constant 0 : i32
    %c0_i32_0 = arith.constant 0 : i32
    %c0_i32_1 = arith.constant 0 : i32
    return %c0_i32, %c0_i32_0 : i32, i32
  }
  func.func @transform_5(%arg0: i32) -> (i32, i32) {
    %c0_i32 = arith.constant 0 : i32
    %c0_i32_0 = arith.constant 0 : i32
    %c0_i32_1 = arith.constant 0 : i32
    return %c0_i32, %c0_i32_0 : i32, i32
  }
}

</mosaic_0001>

<bundles_post_ra>
// kernel: fused_conv1x1.1
= control target key start
LH: loop header
LB: loop body
LE: loop exit
PB: predicated region body
PF: predicated region fallthrough
CT: control target
= control target key end

     0   :  { %v752_v3 = vmov 0   ;;  %vm96_vm0 = vcmask 523264   ;;  %vm331_vm1 = vcmask 261120   ;;  %s1083_s1 = inlined_call_operand.vmem [shape: f32[320,32], index: 1, kind: input, shape index: {}]   ;;  %s1084_s3 = inlined_call_operand.vmem [shape: f32[64,320], index: 3, kind: input, shape index: {}]   ;;  %s1085_s0 = inlined_call_operand.vmem [shape: f32[32,32], index: 0, kind: input, shape index: {}]   ;;  %s1086_s4 = inlined_call_operand.vmem [shape: f32[64,1], index: 4, kind: input, shape index: {}]   ;;  %s1087_s2 = inlined_call_operand.vmem [shape: f32[64,32], index: 2, kind: input, shape index: {}]   ;;  %s1088_s5 = inlined_call_operand.vmem [shape: f32[64,32], index: 5, kind: output, shape index: {}]  }
   0x1   :  { %v72_v0 = vld [vmem:[%s1083_s1 + $0x80] sm:$0xff]  ;;  %v73_v1 = vld [vmem:[%s1083_s1 + $0x88] sm:$0xff]  ;;  %750 = vset.pattern.permute.xlu0 %v752_v3  ;;  %751 = vset.pattern.permute.xlu1 %v752_v3  ;;  %v74_v10 = vld [vmem:[%s1083_s1 + $0x90] sm:$0xff] }
   0x2   :  { %v56_v2 = vld [vmem:[%s1083_s1] sm:$0xff]  ;;  %v677_v4 = vpack.c.bf16 %v73_v1, %v72_v0  ;;  %v57_v5 = vld [vmem:[%s1083_s1 + $0x8] sm:$0xff]  ;;  %v75_v11 = vld [vmem:[%s1083_s1 + $0x98] sm:$0xff] }
   0x3   :  { %v88_v6 = vld [vmem:[%s1083_s1 + $0x100] sm:$0xff]  ;;  %v89_v7 = vld [vmem:[%s1083_s1 + $0x108] sm:$0xff]  ;;  %v679_v8 = vpack.c.bf16 %v57_v5, %v56_v2  ;;  %v58_v12 = vld [vmem:[%s1083_s1 + $0x10] sm:$0xff]  ;;  %v681_v13 = vpack.c.bf16 %v75_v11, %v74_v10 }
   0x4   :  { %v709_v9 = vpack.c.bf16 %v89_v7, %v88_v6  ;;  %678 = vmatprep.subr.bf16.mxu0 %v677_v4  ;;  %v59_v14 = vld [vmem:[%s1083_s1 + $0x18] sm:$0xff]  ;;  %v90_v15 = vld [vmem:[%s1083_s1 + $0x110] sm:$0xff]  ;;  %v76_v19 = vld [vmem:[%s1083_s1 + $0xa0] sm:$0xff] }
   0x5   :  { %v91_v16 = vld [vmem:[%s1083_s1 + $0x118] sm:$0xff]  ;;  %680 = vmatpush3.bf16.msra.mxu0 %v679_v8  ;;  %v683_v17 = vpack.c.bf16 %v59_v14, %v58_v12  ;;  %v77_v20 = vld [vmem:[%s1083_s1 + $0xa8] sm:$0xff]  ;;  %v60_v21 = vld [vmem:[%s1083_s1 + $0x20] sm:$0xff] }
   0x6   :  { %710 = vmatprep.subr.bf16.mxu1 %v709_v9  ;;  %v713_v18 = vpack.c.bf16 %v91_v16, %v90_v15  ;;  %682 = vmatprep.subr.bf16.mxu0 %v681_v13  ;;  %v685_v22 = vpack.c.bf16 %v77_v20, %v76_v19  ;;  %v61_v23 = vld [vmem:[%s1083_s1 + $0x28] sm:$0xff]  ;;  %v92_v24 = vld [vmem:[%s1083_s1 + $0x120] sm:$0xff]  ;;  %v78_v27 = vld [vmem:[%s1083_s1 + $0xb0] sm:$0xff] }
   0x7   :  { %712 = vmatpush3.bf16.msra.mxu1 %v709_v9  ;;  %v93_v25 = vld [vmem:[%s1083_s1 + $0x128] sm:$0xff]  ;;  %v79_v28 = vld [vmem:[%s1083_s1 + $0xb8] sm:$0xff]  ;;  %v94_v29 = vld [vmem:[%s1083_s1 + $0x130] sm:$0xff]  ;;  %v687_v31 = vpack.c.bf16 %v61_v23, %v60_v21 }
   0x8   :  { %714 = vmatprep.subr.bf16.mxu1 %v713_v18  ;;  %v717_v26 = vpack.c.bf16 %v93_v25, %v92_v24  ;;  %v95_v30 = vld [vmem:[%s1083_s1 + $0x138] sm:$0xff]  ;;  %v34_v32 = vld [vmem:[%s1084_s3 + $0x10] sm:$0xff]  ;;  %v689_v33 = vpack.c.bf16 %v79_v28, %v78_v27  ;;  %v80_v37 = vld [vmem:[%s1083_s1 + $0xc0] sm:$0xff] }
   0x9   :  { %684 = vmatpush3.bf16.msra.mxu0 %v683_v17  ;;  %v62_v34 = vld [vmem:[%s1083_s1 + $0x30] sm:$0xff]  ;;  %v63_v35 = vld [vmem:[%s1083_s1 + $0x38] sm:$0xff]  ;;  %v721_v36 = vpack.c.bf16 %v95_v30, %v94_v29  ;;  %v81_v38 = vld [vmem:[%s1083_s1 + $0xc8] sm:$0xff]  ;;  %645 = vmatprep.mubr.msk.f32.mxu1 %vm96_vm0, %v34_v32 }
   0xa   :  { %686 = vmatprep.subr.bf16.mxu0 %v685_v22  ;;  %v691_v39 = vpack.c.bf16 %v63_v35, %v62_v34  ;;  %v693_v40 = vpack.c.bf16 %v81_v38, %v80_v37  ;;  %v64_v41 = vld [vmem:[%s1083_s1 + $0x40] sm:$0xff]  ;;  %v65_v42 = vld [vmem:[%s1083_s1 + $0x48] sm:$0xff]  ;;  %v82_v43 = vld [vmem:[%s1083_s1 + $0xd0] sm:$0xff] }
   0xb   :  { %716 = vmatpush3.bf16.msra.mxu1 %v713_v18  ;;  %v83_v44 = vld [vmem:[%s1083_s1 + $0xd8] sm:$0xff]  ;;  %v28_v45 = vld [vmem:[%s1085_s0] sm:$0xff]  ;;  %v29_v46 = vld [vmem:[%s1085_s0 + $0x8] sm:$0xff]  ;;  %v695_v48 = vpack.c.bf16 %v65_v42, %v64_v41 }
   0xc   :  { %718 = vmatprep.subr.bf16.mxu1 %v717_v26  ;;  %v725_v47 = vpack.c.bf16 %v29_v46, %v28_v45  ;;  %v37_v49 = vld [vmem:[%s1084_s3 + $0x28] sm:$0xff]  ;;  %v66_v50 = vld [vmem:[%s1083_s1 + $0x50] sm:$0xff]  ;;  %v697_v52 = vpack.c.bf16 %v83_v44, %v82_v43  ;;  %v67_v53 = vld [vmem:[%s1083_s1 + $0x58] sm:$0xff] }
   0xd   :  { %688 = vmatpush3.bf16.msra.mxu0 %v687_v31  ;;  %v30_v51 = vld [vmem:[%s1085_s0 + $0x10] sm:$0xff]  ;;  %v31_v54 = vld [vmem:[%s1085_s0 + $0x18] sm:$0xff]  ;;  %v33_v55 = vld [vmem:[%s1084_s3 + $0x8] sm:$0xff]  ;;  %v699_v60 = vpack.c.bf16 %v67_v53, %v66_v50 }
   0xe   :  { %690 = vmatprep.subr.bf16.mxu0 %v689_v33  ;;  %v40_v56 = vld [vmem:[%s1084_s3 + $0x40] sm:$0xff]  ;;  %v85_v58 = vld [vmem:[%s1083_s1 + $0xe8] sm:$0xff]  ;;  %185 = vmatprep.mubr.f32.mxu0 %v33_v55  ;;  %v729_v59 = vpack.c.bf16 %v31_v54, %v30_v51  ;;  %v43_v61 = vld [vmem:[%s1084_s3 + $0x58] sm:$0xff] }
   0xf   :  { %720 = vmatpush3.bf16.msra.mxu1 %v717_v26  ;;  %v84_v57 = vld [vmem:[%s1083_s1 + $0xe0] sm:$0xff]  ;;  %v69_v0 = vld [vmem:[%s1083_s1 + $0x68] sm:$0xff]  ;;  %v46_v1 = vld [vmem:[%s1084_s3 + $0x70] sm:$0xff] }
  0x10   :  { %722 = vmatprep.subr.bf16.mxu1 %v721_v36  ;;  %v701_v62 = vpack.c.bf16 %v85_v58, %v84_v57  ;;  %v68_v63 = vld [vmem:[%s1083_s1 + $0x60] sm:$0xff]  ;;  %v86_v2 = vld [vmem:[%s1083_s1 + $0xf0] sm:$0xff]  ;;  %v87_v3 = vld [vmem:[%s1083_s1 + $0xf8] sm:$0xff] }
  0x11   :  { %692 = vmatpush3.bf16.msra.mxu0 %v691_v39  ;;  %v703_v4 = vpack.c.bf16 %v69_v0, %v68_v63  ;;  %v49_v5 = vld [vmem:[%s1084_s3 + $0x88] sm:$0xff]  ;;  %v70_v6 = vld [vmem:[%s1083_s1 + $0x70] sm:$0xff]  ;;  %v705_v7 = vpack.c.bf16 %v87_v3, %v86_v2  ;;  %v71_v8 = vld [vmem:[%s1083_s1 + $0x78] sm:$0xff] }
  0x12   :  { %694 = vmatprep.subr.bf16.mxu0 %v693_v40  ;;  %v461_v9 = vld [vmem:[%s1086_s4] sm:$0xff]  ;;  %v463_v10 = vld [vmem:[%s1086_s4 + $0x10] sm:$0xff]  ;;  %v462_v12 = vld [vmem:[%s1086_s4 + $0x8] sm:$0xff]  ;;  %v707_v13 = vpack.c.bf16 %v71_v8, %v70_v6 }
  0x13   :  { %724 = vmatpush3.bf16.msra.mxu1 %v721_v36  ;;  %v52_v11 = vld [vmem:[%s1084_s3 + $0xa0] sm:$0xff]  ;;  %471 = vperm.xlu0 %750, %v461_v9   ;;  %v464_v14 = vld [vmem:[%s1086_s4 + $0x18] sm:$0xff]  ;;  %v466_v19 = vld [vmem:[%s1086_s4 + $0x28] sm:$0xff] }
  0x14   :  { %726 = vmatprep.subr.bf16.mxu1 %v725_v47  ;;  %481 = vperm.xlu1 %751, %v463_v10   ;;  %v55_v15 = vld [vmem:[%s1084_s3 + $0xb8] sm:$0xff]  ;;  %v20_v16 = vld [vmem:[%s1087_s2] sm:$0xff]  ;;  %v21_v20 = vld [vmem:[%s1087_s2 + $0x8] sm:$0xff] }
  0x15   :  { %696 = vmatpush3.bf16.msra.mxu0 %v695_v48  ;;  %v465_v17 = vld [vmem:[%s1086_s4 + $0x20] sm:$0xff]  ;;  %v22_v22 = vld [vmem:[%s1087_s2 + $0x10] sm:$0xff]  ;;  %v35_v24 = vld [vmem:[%s1084_s3 + $0x18] sm:$0xff] }
  0x16   :  { %646 = vmatmul.mubr.msk.f32.vlgmr.msra.gmra.mrb[0].mxu1 %vm96_vm0, %v37_v49  ;;  %698 = vmatprep.subr.bf16.mxu0 %v697_v52  ;;  %v32_v18 = vld [vmem:[%s1084_s3] sm:$0xff]  ;;  %v467_v23 = vld [vmem:[%s1086_s4 + $0x30] sm:$0xff]  ;;  %v468_v25 = vld [vmem:[%s1086_s4 + $0x38] sm:$0xff] }
  0x17   :  { %648 = vmatprep.mubr.msk.f32.mxu1 %vm96_vm0, %v40_v56  ;;  %728 = vmatpush3.bf16.msra.mxu1 %v725_v47  ;;  %v36_v21 = vld [vmem:[%s1084_s3 + $0x20] sm:$0xff]  ;;  %v23_v26 = vld [vmem:[%s1087_s2 + $0x18] sm:$0xff]  ;;  %v38_v29 = vld [vmem:[%s1084_s3 + $0x30] sm:$0xff] }
  0x18   :  { %730 = vmatprep.subr.bf16.mxu1 %v729_v59  ;;  %476 = vperm.xlu0 %750, %v462_v12   ;;  %v39_v27 = vld [vmem:[%s1084_s3 + $0x38] sm:$0xff]  ;;  %v24_v28 = vld [vmem:[%s1087_s2 + $0x20] sm:$0xff]  ;;  %v25_v30 = vld [vmem:[%s1087_s2 + $0x28] sm:$0xff] }
  0x19   :  { %700 = vmatpush3.bf16.msra.mxu0 %v699_v60  ;;  %486 = vperm.xlu1 %751, %v464_v14   ;;  %v42_v31 = vld [vmem:[%s1084_s3 + $0x50] sm:$0xff]  ;;  %v41_v33 = vld [vmem:[%s1084_s3 + $0x48] sm:$0xff]  ;;  %v27_v34 = vld [vmem:[%s1087_s2 + $0x38] sm:$0xff] }
  0x1a   :  { %649 = vmatmul.mubr.msk.f32.gmra.mrb[2].mxu1 %vm96_vm0, %v43_v61  ;;  %702 = vmatprep.subr.bf16.mxu0 %v701_v62  ;;  %v26_v32 = vld [vmem:[%s1087_s2 + $0x30] sm:$0xff]  ;;  %v45_v35 = vld [vmem:[%s1084_s3 + $0x68] sm:$0xff]  ;;  %v44_v36 = vld [vmem:[%s1084_s3 + $0x60] sm:$0xff] }
  0x1b   :  { %651 = vmatprep.mubr.msk.f32.mxu1 %vm96_vm0, %v46_v1  ;;  %732 = vmatpush3.bf16.msra.mxu1 %v729_v59  ;;  %v48_v37 = vld [vmem:[%s1084_s3 + $0x80] sm:$0xff]  ;;  %v47_v38 = vld [vmem:[%s1084_s3 + $0x78] sm:$0xff]  ;;  %v50_v40 = vld [vmem:[%s1084_s3 + $0x90] sm:$0xff] }
  0x1c   :  { %491 = vperm.xlu0 %750, %v465_v17   ;;  %v51_v39 = vld [vmem:[%s1084_s3 + $0x98] sm:$0xff]  ;;  %v54_v41 = vld [vmem:[%s1084_s3 + $0xb0] sm:$0xff]  ;;  %v53_v42 = vld [vmem:[%s1084_s3 + $0xa8] sm:$0xff] }
  0x1d   :  { %704 = vmatpush3.bf16.msra.mxu0 %v703_v4  ;;  %496 = vperm.xlu1 %751, %v466_v19  }
  0x1e   :  { %652 = vmatmul.mubr.msk.f32.gmra.mrb[4].mxu1 %vm96_vm0, %v49_v5  ;;  %706 = vmatprep.subr.bf16.mxu0 %v705_v7 }
  0x1f   :  { %654 = vmatprep.mubr.msk.f32.mxu1 %vm96_vm0, %v52_v11 }
  0x20   :  { %501 = vperm.xlu0 %750, %v467_v23  }
  0x21   :  { %708 = vmatpush3.bf16.msra.mxu0 %v707_v13  ;;  %506 = vperm.xlu1 %751, %v468_v25  }
  0x22   :  { %655 = vmatmul.mubr.msk.f32.gmra.mrb[6].mxu1 %vm96_vm0, %v55_v15 }
  0x23   :  { %665 = vmatprep.mubr.msk.f32.mxu1 %vm331_vm1, %v20_v16 }
  0x24   :  { %186 = vmatmul.mubr.f32.vlgmr.msra.gmra.mrb[0].mxu0 %v32_v18 }
  0x25   :  { %190 = vmatprep.mubr.f32.mxu0 %v36_v21 }
  0x26   :  { %666 = vmatmul.mubr.msk.f32.vlgmr.msra.gmra.mrb[0].mxu1 %vm331_vm1, %v21_v20 }
  0x27   :  { %668 = vmatprep.mubr.msk.f32.mxu1 %vm331_vm1, %v22_v22 }
  0x28   :  { %191 = vmatmul.mubr.f32.gmra.mrb[2].mxu0 %v35_v24 }
  0x29   :  { %195 = vmatprep.mubr.f32.mxu0 %v39_v27 }
  0x2a   :  { %669 = vmatmul.mubr.msk.f32.gmra.mrb[2].mxu1 %vm331_vm1, %v23_v26 }
  0x2b   :  { %671 = vmatprep.mubr.msk.f32.mxu1 %vm331_vm1, %v24_v28 }
  0x2c   :  { %196 = vmatmul.mubr.f32.gmra.mrb[4].mxu0 %v38_v29 }
  0x2d   :  { %200 = vmatprep.mubr.f32.mxu0 %v42_v31 }
  0x2e   :  { %672 = vmatmul.mubr.msk.f32.gmra.mrb[4].mxu1 %vm331_vm1, %v25_v30 }
  0x2f   :  { %674 = vmatprep.mubr.msk.f32.mxu1 %vm331_vm1, %v26_v32 }
  0x30   :  { %201 = vmatmul.mubr.f32.gmra.mrb[6].mxu0 %v41_v33 }
  0x31   :  { %205 = vmatprep.mubr.f32.mxu0 %v45_v35 }
  0x32   :  { %675 = vmatmul.mubr.msk.f32.gmra.mrb[6].mxu1 %vm331_vm1, %v27_v34 }
  0x34   :  { %206 = vmatmul.mubr.f32.gmra.mrb[8].mxu0 %v44_v36 }
  0x35   :  { %210 = vmatprep.mubr.f32.mxu0 %v48_v37 }
  0x38   :  { %211 = vmatmul.mubr.f32.gmra.mrb[10].mxu0 %v47_v38 }
  0x39   :  { %215 = vmatprep.mubr.f32.mxu0 %v51_v39 }
  0x3c   :  { %216 = vmatmul.mubr.f32.gmra.mrb[12].mxu0 %v50_v40 }
  0x3d   :  { %220 = vmatprep.mubr.f32.mxu0 %v54_v41 }
  0x40   :  { %221 = vmatmul.mubr.f32.gmra.mrb[14].mxu0 %v53_v42 }
  0x92   :  { %v472_v44 = vpop.permute.xlu0 %471 }
  0x93   :  { %v482_v0 = vpop.permute.xlu1 %481 }
  0x97   :  { %v477_v56 = vpop.permute.xlu0 %476 }
  0x98   :  { %v487_v10 = vpop.permute.xlu1 %486 }
  0x9b   :  { %v492_v16 = vpop.permute.xlu0 %491 }
  0x9c   :  { %v497_v22 = vpop.permute.xlu1 %496 }
  0x9f   :  { %v502_v28 = vpop.permute.xlu0 %501 }
  0xa0   :  { %v507_v33 = vpop.permute.xlu1 %506 }
  0xf7   :  { %v577_v43 = vpop.f32.mrb[0].mxu0 }
  0xf8   :  { %v578_v45 = vpop.f32.mrb[1].mxu0 }
  0xf9   :  { %v667_v46 = vpop.f32.mrb[0].mxu1  ;;  %v579_v47 = vadd.f32 %v578_v45, %v577_v43 }
  0xfa   :  { %v422_v48 = vpop.f32.mrb[1].mxu1 }
  0xfb   :  { %v734_v49 = vadd.f32 %v579_v47, %v422_v48  ;;  %v580_v50 = vpop.f32.mrb[2].mxu0 }
  0xfc   :  { %v581_v51 = vpop.f32.mrb[3].mxu0 }
  0xfd   :  { %v670_v52 = vpop.f32.mrb[2].mxu1  ;;  %v509_v53 = vadd.f32 %v734_v49, %v472_v44  ;;  %v582_v54 = vadd.f32 %v581_v51, %v580_v50 }
  0xfe   :  { %v432_v55 = vpop.f32.mrb[3].mxu1 }
  0xff   :  { %517 = vst.msk [vmem:[%s1088_s5] sm:$0xff] %vm331_vm1, %v509_v53  ;;  %v583_v57 = vpop.f32.mrb[4].mxu0  ;;  %v733_v58 = vadd.f32 %v667_v46, %v582_v54 }
 0x100   :  { %v584_v59 = vpop.f32.mrb[5].mxu0 }
 0x101   :  { %v673_v60 = vpop.f32.mrb[4].mxu1  ;;  %v510_v61 = vadd.f32 %v733_v58, %v477_v56  ;;  %v585_v62 = vadd.f32 %v584_v59, %v583_v57 }
 0x102   :  { %v442_v63 = vpop.f32.mrb[5].mxu1 }
 0x103   :  { %518 = vst.msk [vmem:[%s1088_s5 + $0x8] sm:$0xff] %vm331_vm1, %v510_v61  ;;  %v736_v1 = vadd.f32 %v585_v62, %v432_v55  ;;  %v586_v2 = vpop.f32.mrb[6].mxu0 }
 0x104   :  { %v587_v3 = vpop.f32.mrb[7].mxu0 }
 0x105   :  { %v676_v4 = vpop.f32.mrb[6].mxu1  ;;  %v511_v5 = vadd.f32 %v736_v1, %v482_v0  ;;  %v588_v6 = vadd.f32 %v587_v3, %v586_v2 }
 0x106   :  { %v452_v7 = vpop.f32.mrb[7].mxu1 }
 0x107   :  { %519 = vst.msk [vmem:[%s1088_s5 + $0x10] sm:$0xff] %vm331_vm1, %v511_v5  ;;  %v735_v8 = vadd.f32 %v670_v52, %v588_v6  ;;  %v589_v9 = vpop.f32.mrb[8].mxu0 }
 0x108   :  { %v590_v11 = vpop.f32.mrb[9].mxu0 }
 0x109   :  { %v512_v12 = vadd.f32 %v735_v8, %v487_v10  ;;  %v591_v13 = vadd.f32 %v590_v11, %v589_v9 }
 0x10b   :  { %520 = vst.msk [vmem:[%s1088_s5 + $0x18] sm:$0xff] %vm331_vm1, %v512_v12  ;;  %v738_v14 = vadd.f32 %v591_v13, %v442_v63  ;;  %v592_v15 = vpop.f32.mrb[10].mxu0 }
 0x10c   :  { %v593_v17 = vpop.f32.mrb[11].mxu0 }
 0x10d   :  { %v513_v18 = vadd.f32 %v738_v14, %v492_v16  ;;  %v594_v19 = vadd.f32 %v593_v17, %v592_v15 }
 0x10f   :  { %521 = vst.msk [vmem:[%s1088_s5 + $0x20] sm:$0xff] %vm331_vm1, %v513_v18  ;;  %v737_v20 = vadd.f32 %v673_v60, %v594_v19  ;;  %v595_v21 = vpop.f32.mrb[12].mxu0 }
 0x110   :  { %v596_v23 = vpop.f32.mrb[13].mxu0 }
 0x111   :  { %v514_v24 = vadd.f32 %v737_v20, %v497_v22  ;;  %v597_v25 = vadd.f32 %v596_v23, %v595_v21 }
 0x113   :  { %522 = vst.msk [vmem:[%s1088_s5 + $0x28] sm:$0xff] %vm331_vm1, %v514_v24  ;;  %v740_v26 = vadd.f32 %v597_v25, %v452_v7  ;;  %v598_v27 = vpop.f32.mrb[14].mxu0 }
 0x114   :  { %v599_v29 = vpop.f32.mrb[15].mxu0 }
 0x115   :  { %v515_v30 = vadd.f32 %v740_v26, %v502_v28  ;;  %v600_v31 = vadd.f32 %v599_v29, %v598_v27 }
 0x117   :  { %523 = vst.msk [vmem:[%s1088_s5 + $0x30] sm:$0xff] %vm331_vm1, %v515_v30  ;;  %v739_v32 = vadd.f32 %v676_v4, %v600_v31 }
 0x119   :  { %v516_v34 = vadd.f32 %v739_v32, %v507_v33 }
 0x11b   :  { %524 = vst.msk [vmem:[%s1088_s5 + $0x38] sm:$0xff] %vm331_vm1, %v516_v34 }

</bundles_post_ra>
